<compile_context>
chip_gen: v7x
topology: tpu7x:2x2x1
jax: 0.10.0
libtpu: 0.0.40
codegen_flags: <defaults>
</compile_context>

<pallas_src>
import jax
import jax.numpy as jnp
from jax.experimental import pallas as pl
from jax.experimental.pallas import tpu as pltpu


def _round_up(n, m):
    return ((n + m - 1) // m) * m


def _pad_to(a, shape):
    pads = [(0, s - d) for d, s in zip(a.shape, shape)]
    if any(p[1] for p in pads):
        a = jnp.pad(a, pads)
    return a


def _film_kernel(x_ref, s_ref, t_ref, w0_ref, w1_ref, b1_ref, o_ref):
    # blocks[0]: (tile_t, Cin_p) @ (Cin_p, Cout_p) on the MXU, f32 accumulation.
    # x arrives f32; the bf16 cast happens here (VPU filler under MXU/DMA slack).
    h = jnp.dot(x_ref[...].astype(jnp.bfloat16), w0_ref[...],
                preferred_element_type=jnp.float32)
    # FiLM epilogue in f32 on the VPU.  blocks[0].bias is already folded into t_ref
    # (= scale*b0 + bias); the (1, Cout_p) rows broadcast over the tile for free.
    h = s_ref[...] * h + t_ref[...]
    # blocks[1]: (tile_t, Cout_p) @ (Cout_p, Cout_p) on the MXU, f32 accumulation.
    out = jnp.dot(h.astype(jnp.bfloat16), w1_ref[...],
                  preferred_element_type=jnp.float32)
    o_ref[...] = (out + b1_ref[...]).astype(o_ref.dtype)


def film_conditional_block(x, cond, params, out_dtype=None):
    """x: [B, T, C_in] f32 (channels-last), cond: [B, cond_dim] f32 -> [B, T, C_out]."""
    B, T, C_in = x.shape
    C_out = params["w0t"].shape[1]
    out_dtype = x.dtype if out_dtype is None else out_dtype

    # ---- cond_encoder, hoisted to plain XLA (runs once per call on (B, cond_dim)) ----
    # Mish(c) = c * tanh(softplus(c)); jax.nn.softplus avoids inf intermediates.
    mish = cond * jnp.tanh(jax.nn.softplus(cond))
    embed = mish @ params["wct"] + params["bc"]                     # (B, 2*C_out)
    scale = embed[:, :C_out]                                        # (B, C_out)
    bias = embed[:, C_out:]                                         # (B, C_out)
    # Fold blocks[0].bias into the FiLM bias (tiny per-batch op):
    #   scale*(x@W0 + b0) + bias == scale*(x@W0) + (scale*b0 + bias)
    bias = scale * params["b0"][None, :] + bias

    # ---- TPU-friendly shapes: lane-dense channels, sublane-aligned horizon tiles ----
    LANE = 128
    cin_p = _round_up(C_in, LANE)
    cout_p = _round_up(C_out, LANE)

    # Horizon tile: as big as T allows (better HBM roofline / less per-step overhead),
    # but keep >= 4 total grid steps when possible so v7x's 2 TensorCores both get work.
    tile_t = min(_round_up(T, 8), 512)
    while tile_t > 8 and B * pl.cdiv(T, tile_t) < 4:
        tile_t = _round_up(max(tile_t // 2, 8), 8)
    t_p = _round_up(T, tile_t)
    grid = (B, t_p // tile_t)

    x_p = _pad_to(x, (B, t_p, cin_p))                               # stays f32; cast in-kernel
    fscale_p = _pad_to(scale[:, None, :], (B, 1, cout_p))           # (B, 1, Cout_p) f32
    fbias_p = _pad_to(bias[:, None, :], (B, 1, cout_p))             # (B, 1, Cout_p) f32
    w0_p = _pad_to(params["w0t"], (cin_p, cout_p)).astype(jnp.bfloat16)
    w1_p = _pad_to(params["w1t"], (cout_p, cout_p)).astype(jnp.bfloat16)
    b1_p = _pad_to(params["b1"][None, :], (1, cout_p))              # (1, Cout_p) f32

    row3 = lambda b, t: (b, t, 0)       # per (batch, horizon-tile) blocks
    per_b = lambda b, t: (b, 0, 0)      # per-batch FiLM rows
    const = lambda b, t: (0, 0)         # VMEM-resident weights / bias

    out_itemsize = jnp.finfo(out_dtype).bits // 8
    flops = 2 * B * t_p * cout_p * (cin_p + cout_p)
    bytes_accessed = (
        B * t_p * cin_p * 4                                   # x (f32, cast in-kernel)
        + (cin_p * cout_p + cout_p * cout_p) * 2              # W0, W1 (bf16)
        + 2 * B * cout_p * 4 + cout_p * 4                     # scale, bias', b1 (f32)
        + B * t_p * cout_p * out_itemsize)                    # output

    # VMEM: double-buffered activation tiles + (double-buffered) resident weights.
    weight_bytes = (cin_p * cout_p + cout_p * cout_p) * 2 + cout_p * 4
    tile_bytes = tile_t * cin_p * 4 + tile_t * cout_p * out_itemsize + 2 * cout_p * 4
    vmem_limit = int(min(max(2 * (weight_bytes + tile_bytes) + (4 << 20), 32 << 20), 100 << 20))

    out_p = pl.pallas_call(
        _film_kernel,
        out_shape=jax.ShapeDtypeStruct((B, t_p, cout_p), out_dtype),
        grid=grid,
        in_specs=[
            pl.BlockSpec((None, tile_t, cin_p), row3),    # x rows (f32)
            pl.BlockSpec((None, 1, cout_p), per_b),       # FiLM scale, per batch (f32)
            pl.BlockSpec((None, 1, cout_p), per_b),       # FiLM bias (b0 folded), per batch (f32)
            pl.BlockSpec((cin_p, cout_p), const),         # W0^T (bf16), VMEM-resident
            pl.BlockSpec((cout_p, cout_p), const),        # W1^T (bf16), VMEM-resident
            pl.BlockSpec((1, cout_p), const),             # b1 (f32)
        ],
        out_specs=pl.BlockSpec((None, tile_t, cout_p), row3),
        compiler_params=pltpu.CompilerParams(
            dimension_semantics=("parallel", "parallel"),
            vmem_limit_bytes=vmem_limit),
        cost_estimate=pl.CostEstimate(
            flops=flops, transcendentals=0, bytes_accessed=bytes_accessed),
    )(x_p, fscale_p, fbias_p, w0_p, w1_p, b1_p)

    # TODO(synk): on v7x (64 MiB VMEM), single-buffer the constant weight specs with
    # pipeline_mode=pl.Buffered(1) and, once (cin_p*cout_p + cout_p^2)*2 B exceeds ~24 MiB,
    # add an inner "arbitrary" grid axis over W1's output columns (cache h in VMEM scratch,
    # first GEMM + FiLM only under pl.when(col == 0)).
    # TODO(synk): for tiny horizons with very large batch, pack several batches per tile
    # if the per-step pipeline overhead ever dominates.
    return out_p[:, :T, :C_out]


def init_params(key, in_channels, out_channels, cond_dim):
    """nn.Linear-style init (uniform(-1/sqrt(fan_in), 1/sqrt(fan_in))); weights stored
    pre-transposed as (fan_in, fan_out) for row-major matmuls."""
    ks = jax.random.split(key, 6)

    def lin(kw, kb, fan_in, fan_out):
        bound = 1.0 / jnp.sqrt(fan_in)
        w = jax.random.uniform(kw, (fan_in, fan_out), jnp.float32, -bound, bound)
        b = jax.random.uniform(kb, (fan_out,), jnp.float32, -bound, bound)
        return w, b

    w0t, b0 = lin(ks[0], ks[1], in_channels, out_channels)            # blocks[0]
    w1t, b1 = lin(ks[2], ks[3], out_channels, out_channels)           # blocks[1]
    wct, bc = lin(ks[4], ks[5], cond_dim, 2 * out_channels)           # cond_encoder Linear
    return dict(w0t=w0t, b0=b0, w1t=w1t, b1=b1, wct=wct, bc=bc)


def film_reference(x, cond, params, matmul_dtype=jnp.float32):
    """Pure-JAX reference mirroring the PyTorch forward (FiLM broadcast over horizon).
    matmul_dtype=bfloat16 mirrors the kernel's MXU operand precision (f32 accumulation)."""
    C_out = params["w0t"].shape[1]
    mish = cond * jnp.tanh(jax.nn.softplus(cond))
    embed = mish @ params["wct"] + params["bc"]
    scale = embed[:, :C_out][:, None, :]
    bias = embed[:, C_out:][:, None, :]
    dot = lambda a, b: jnp.dot(a.astype(matmul_dtype), b.astype(matmul_dtype),
                               preferred_element_type=jnp.float32)
    h = dot(x, params["w0t"]) + params["b0"]
    h = scale * h + bias
    return dot(h, params["w1t"]) + params["b1"]


if __name__ == "__main__":
    B, T, C_in, C_out, COND = 2, 8, 4, 8, 6

    key = jax.random.PRNGKey(0)
    kx, kc, kp = jax.random.split(key, 3)
    x = jax.random.normal(kx, (B, T, C_in), jnp.float32)
    cond = jax.random.normal(kc, (B, COND), jnp.float32)
    params = init_params(kp, C_in, C_out, COND)

    out = jax.jit(film_conditional_block)(x, cond, params)
    out = jax.block_until_ready(out)
    assert out.shape == (B, T, C_out) and out.dtype == jnp.float32

    # Kernel-precision mirror (bf16 MXU operands, f32 accumulation/epilogue): tight match.
    ref_bf16 = film_reference(x, cond, params, matmul_dtype=jnp.bfloat16)
    assert jnp.allclose(out, ref_bf16, atol=5e-3, rtol=5e-3), "mismatch vs bf16-operand reference"
    # Full-f32 module semantics: loose match (bf16 operand rounding only).
    ref_f32 = film_reference(x, cond, params)
    assert jnp.allclose(out, ref_f32, atol=1e-1, rtol=1e-1), "mismatch vs f32 reference"

    # bf16 output path (halves store traffic when the downstream consumer tolerates it).
    out_bf16 = jax.jit(
        lambda a, c, p: film_conditional_block(a, c, p, out_dtype=jnp.bfloat16)
    )(x, cond, params)
    out_bf16 = jax.block_until_ready(out_bf16)
    assert out_bf16.dtype == jnp.bfloat16 and out_bf16.shape == (B, T, C_out)
    assert jnp.allclose(out_bf16.astype(jnp.float32), ref_bf16, atol=1e-1, rtol=1e-1)

    # TODO(synk): the PyTorch module caches self.scale/self.bias across calls via set_context;
    # this functional kernel recomputes the FiLM params from `cond` on every call.
    print("KERNEL_OK")
</pallas_src>

<mosaic_0001>
module attributes {stable_mosaic.version = 11 : i64} {
  func.func @_film_kernel(%arg0: i32, %arg1: i32, %arg2: memref<1x8x128xf32, #tpu.memory_space<vmem>>, %arg3: memref<1x1x128xf32, #tpu.memory_space<vmem>>, %arg4: memref<1x1x128xf32, #tpu.memory_space<vmem>>, %arg5: memref<128x128xbf16, #tpu.memory_space<vmem>>, %arg6: memref<128x128xbf16, #tpu.memory_space<vmem>>, %arg7: memref<1x128xf32, #tpu.memory_space<vmem>>, %arg8: memref<1x8x128xf32, #tpu.memory_space<vmem>>) attributes {dimension_semantics = [#tpu.dimension_semantics<parallel>, #tpu.dimension_semantics<parallel>], iteration_bounds = array<i64: 2, 1>, scalar_prefetch = 0 : i64, scratch_operands = 0 : i64, tpu.core_type = #tpu.core_type<tc>, window_params = [{transform_indices = @transform_0, window_bounds = array<i64: 1, 8, 128>}, {transform_indices = @transform_1, window_bounds = array<i64: 1, 1, 128>}, {transform_indices = @transform_2, window_bounds = array<i64: 1, 1, 128>}, {pipeline_mode = #tpu.pipeline_mode<synchronous>, transform_indices = @transform_3, window_bounds = array<i64: 128, 128>}, {pipeline_mode = #tpu.pipeline_mode<synchronous>, transform_indices = @transform_4, window_bounds = array<i64: 128, 128>}, {pipeline_mode = #tpu.pipeline_mode<synchronous>, transform_indices = @transform_5, window_bounds = array<i64: 1, 128>}, {transform_indices = @transform_6, window_bounds = array<i64: 1, 8, 128>}]} {
    %c0 = arith.constant 0 : index
    %c0_0 = arith.constant 0 : index
    %c0_1 = arith.constant 0 : index
    %0 = vector.load %arg2[%c0, %c0_0, %c0_1] : memref<1x8x128xf32, #tpu.memory_space<vmem>>, vector<1x8x128xf32>
    %1 = vector.shape_cast %0 : vector<1x8x128xf32> to vector<8x128xf32>
    %2 = arith.truncf %1 : vector<8x128xf32> to vector<8x128xbf16>
    %c0_2 = arith.constant 0 : index
    %c0_3 = arith.constant 0 : index
    %3 = vector.load %arg5[%c0_2, %c0_3] : memref<128x128xbf16, #tpu.memory_space<vmem>>, vector<128x128xbf16>
    %cst = arith.constant dense<0.000000e+00> : vector<8x128xf32>
    %4 = tpu.matmul %2, %3, %cst {dimension_numbers = #tpu.dot_dimension_numbers<[1], [0], [0], [1], [0, 0, 1, 1], [], []>} : vector<8x128xbf16>, vector<128x128xbf16>, vector<8x128xf32> -> vector<8x128xf32>
    %c0_4 = arith.constant 0 : index
    %c0_5 = arith.constant 0 : index
    %c0_6 = arith.constant 0 : index
    %5 = vector.load %arg3[%c0_4, %c0_5, %c0_6] : memref<1x1x128xf32, #tpu.memory_space<vmem>>, vector<1x1x128xf32>
    %6 = vector.shape_cast %5 : vector<1x1x128xf32> to vector<1x128xf32>
    %7 = vector.broadcast %6 : vector<1x128xf32> to vector<8x128xf32>
    %8 = arith.mulf %7, %4 : vector<8x128xf32>
    %c0_7 = arith.constant 0 : index
    %c0_8 = arith.constant 0 : index
    %c0_9 = arith.constant 0 : index
    %9 = vector.load %arg4[%c0_7, %c0_8, %c0_9] : memref<1x1x128xf32, #tpu.memory_space<vmem>>, vector<1x1x128xf32>
    %10 = vector.shape_cast %9 : vector<1x1x128xf32> to vector<1x128xf32>
    %11 = vector.broadcast %10 : vector<1x128xf32> to vector<8x128xf32>
    %12 = arith.addf %8, %11 : vector<8x128xf32>
    %13 = arith.truncf %12 : vector<8x128xf32> to vector<8x128xbf16>
    %c0_10 = arith.constant 0 : index
    %c0_11 = arith.constant 0 : index
    %14 = vector.load %arg6[%c0_10, %c0_11] : memref<128x128xbf16, #tpu.memory_space<vmem>>, vector<128x128xbf16>
    %cst_12 = arith.constant dense<0.000000e+00> : vector<8x128xf32>
    %15 = tpu.matmul %13, %14, %cst_12 {dimension_numbers = #tpu.dot_dimension_numbers<[1], [0], [0], [1], [0, 0, 1, 1], [], []>} : vector<8x128xbf16>, vector<128x128xbf16>, vector<8x128xf32> -> vector<8x128xf32>
    %c0_13 = arith.constant 0 : index
    %c0_14 = arith.constant 0 : index
    %16 = vector.load %arg7[%c0_13, %c0_14] : memref<1x128xf32, #tpu.memory_space<vmem>>, vector<1x128xf32>
    %17 = vector.broadcast %16 : vector<1x128xf32> to vector<8x128xf32>
    %18 = arith.addf %15, %17 : vector<8x128xf32>
    %c0_15 = arith.constant 0 : index
    %c0_16 = arith.constant 0 : index
    %c0_17 = arith.constant 0 : index
    %19 = vector.load %arg8[%c0_15, %c0_16, %c0_17] : memref<1x8x128xf32, #tpu.memory_space<vmem>>, vector<1x8x128xf32>
    %20 = vector.shape_cast %19 : vector<1x8x128xf32> to vector<8x128xf32>
    %21 = vector.shape_cast %18 : vector<8x128xf32> to vector<1x8x128xf32>
    tpu.vector_store %arg8[%c0_15, %c0_16, %c0_17], %21 {strides = array<i32>} : memref<1x8x128xf32, #tpu.memory_space<vmem>>, vector<1x8x128xf32>,
    return
  }
  func.func @transform_0(%arg0: i32, %arg1: i32) -> (i32, i32, i32) {
    %c0_i32 = arith.constant 0 : i32
    %c0_i32_0 = arith.constant 0 : i32
    return %arg0, %arg1, %c0_i32 : i32, i32, i32
  }
  func.func @transform_1(%arg0: i32, %arg1: i32) -> (i32, i32, i32) {
    %c0_i32 = arith.constant 0 : i32
    %c0_i32_0 = arith.constant 0 : i32
    %c0_i32_1 = arith.constant 0 : i32
    return %arg0, %c0_i32, %c0_i32_0 : i32, i32, i32
  }
  func.func @transform_2(%arg0: i32, %arg1: i32) -> (i32, i32, i32) {
    %c0_i32 = arith.constant 0 : i32
    %c0_i32_0 = arith.constant 0 : i32
    %c0_i32_1 = arith.constant 0 : i32
    return %arg0, %c0_i32, %c0_i32_0 : i32, i32, i32
  }
  func.func @transform_3(%arg0: i32, %arg1: i32) -> (i32, i32) {
    %c0_i32 = arith.constant 0 : i32
    %c0_i32_0 = arith.constant 0 : i32
    %c0_i32_1 = arith.constant 0 : i32
    return %c0_i32, %c0_i32_0 : i32, i32
  }
  func.func @transform_4(%arg0: i32, %arg1: i32) -> (i32, i32) {
    %c0_i32 = arith.constant 0 : i32
    %c0_i32_0 = arith.constant 0 : i32
    %c0_i32_1 = arith.constant 0 : i32
    return %c0_i32, %c0_i32_0 : i32, i32
  }
  func.func @transform_5(%arg0: i32, %arg1: i32) -> (i32, i32) {
    %c0_i32 = arith.constant 0 : i32
    %c0_i32_0 = arith.constant 0 : i32
    %c0_i32_1 = arith.constant 0 : i32
    return %c0_i32, %c0_i32_0 : i32, i32
  }
  func.func @transform_6(%arg0: i32, %arg1: i32) -> (i32, i32, i32) {
    %c0_i32 = arith.constant 0 : i32
    %c0_i32_0 = arith.constant 0 : i32
    return %arg0, %arg1, %c0_i32 : i32, i32, i32
  }
}

</mosaic_0001>

<bundles_post_ra>
// kernel: film_conditional_block.1
= control target key start
LH: loop header
LB: loop body
LE: loop exit
PB: predicated region body
PF: predicated region fallthrough
CT: control target
= control target key end

     0   :  { %11 = vsyncpa [#allocation3], 0  ;;  %s1093_s0 = inlined_call_operand.vmem [shape: f32[2,8,128], index: 0, kind: input, shape index: {}]   ;;  %s1094_s1 = inlined_call_operand.vmem [shape: f32[2,1,128], index: 1, kind: input, shape index: {}]   ;;  %s1095_s2 = inlined_call_operand.vmem [shape: f32[2,1,128], index: 2, kind: input, shape index: {}]   ;;  %s1096_s3 = inlined_call_operand.vmem [shape: bf16[128,128], index: 3, kind: input, shape index: {}]   ;;  %s1097_s4 = inlined_call_operand.vmem [shape: bf16[128,128], index: 4, kind: input, shape index: {}]   ;;  %s1098_s5 = inlined_call_operand.vmem [shape: f32[1,128], index: 5, kind: input, shape index: {}]   ;;  %s1099_s6 = inlined_call_operand.hbm [shape: f32[2,8,128], index: 6, kind: output, shape index: {}]  }
   0x1   :  { %13 = vsyncpa [#allocation3 + $0x1], 0  ;;  %s919_s21 = smov 0   ;;  %s921_s22 = smov 0  }
   0x2   :  { %s923_s23 = smov 0   ;;  %s925_s24 = smov 0  }
   0x3   :  { %s927_s25 = smov 0   ;;  %s929_s26 = smov 0  }
   0x4 LB: > { %s640_s27 = sadd.s32 4294967295, %s879_s26   ;;  %s641_s28 = sadd.s32 4294967294, %s879_s26   ;;  %s879_s26 = sphi %s929_s26, %s19_s26   ;;  %s875_s25 = sphi %s927_s25, %s1106_s25   ;;  %s871_s24 = sphi %s925_s24, %s1105_s24   ;;  %s867_s23 = sphi %s923_s23, %s1104_s23   ;;  %s863_s22 = sphi %s921_s22, %s1103_s22   ;;  %s859_s21 = sphi %s919_s21, %s1102_s21  }
   0x5   : > { %s31_s29 = sadd.s32 1, %s875_s25  ;;  %s183_s30 = sadd.s32 1, %s867_s23 }
   0x6   : > { %p33_p0 = scmp.ge.s32.totalorder %s31_s29, 2  ;;  %p193_p1 = scmp.ne.s32.totalorder %s867_s23, %s863_s22 }
   0x7   : > { %p194_p2 = scmp.eq.s32.totalorder %s640_s27, 1  ;;  %p199_p3 = scmp.ne.s32.totalorder %s863_s22, %s859_s21 }
   0x8   : > { %s1108_s29 = smov (%p33_p0, %s31_s29), 0  ;;  %p200_p5 = scmp.eq.s32.totalorder %s641_s28, 1 }
   0x9   : > { %p959_p4 = por %p194_p2, %p193_p1  ;;  %s178_s8 = ssub.s32 %s875_s25, %s1108_s29 }
   0xa   : > { %p644_p6 = scmp.ge.s32.totalorder %s879_s26, 1  ;;  %p181_p7 = scmp.eq.s32.totalorder %s178_s8, 0 }
   0xb   : > { %p966_p8 = por %p200_p5, %p199_p3  ;;  %p249_p9 = scmp.lt.s32.totalorder %s879_s26, 3 }
   0xc   : > { %s972_s10 = scalar_select %p181_p7, %s867_s23, %s183_s30  }
   0xd   : > { %p250_p10 = pnand %p644_p6, %p249_p9 }
   0xe   : > { %v785_v0 = vld [vmem:[%s1096_s3] sm:$0xff] (!%p250_p10)   ;;  %v881_v1 = vmov (!%p250_p10), 0.0   ;;  %v786_v2 = vld [vmem:[%s1096_s3 + $0x8] sm:$0xff] (!%p250_p10)   ;;  %vm882_vm0 = vmmov (!%p250_p10), 0   ;;  %v787_v3 = vld [vmem:[%s1096_s3 + $0x10] sm:$0xff] (!%p250_p10)   ;;  %p287_p11 = scmp.lt.s32.totalorder (!%p250_p10), %s871_s24, 1 }
   0xf   : > { %253 = sbr.rel (%p250_p10) target bundleno = 493 (0x1ed), region = 44  ;;  %688 = vmatprep.subr.bf16.mxu0 (!%p250_p10), %v881_v1  ;;  %708 = vmatprep.subr.bf16.mxu1 (!%p250_p10), %v881_v1  ;;  %v793_v4 = vld [vmem:[%s1097_s4] sm:$0xff] (!%p250_p10)   ;;  %v788_v5 = vld [vmem:[%s1096_s3 + $0x18] sm:$0xff] (!%p250_p10)   ;;  %v794_v6 = vld [vmem:[%s1097_s4 + $0x8] sm:$0xff] (!%p250_p10)   ;;  %s284_s14 = sand.u32 (!%p250_p10), 1, %s863_s22  }
  0x10   : > { %689 = vmatpush3.bf16.msra.mxu0 (!%p250_p10), %v785_v0  ;;  %704 = vmatprep.mubr.msk.bf16.mxu0 (!%p250_p10), %vm882_vm0, %v881_v1  ;;  %v789_v7 = vld [vmem:[%s1096_s3 + $0x20] sm:$0xff] (!%p250_p10)   ;;  %v795_v8 = vld [vmem:[%s1097_s4 + $0x10] sm:$0xff] (!%p250_p10)   ;;  %v790_v9 = vld [vmem:[%s1096_s3 + $0x28] sm:$0xff] (!%p250_p10)   ;;  %s645_s15 = sshll.u32 (!%p250_p10), %s284_s14, 3  ;;  %s883_s8 = smov (!%p250_p10), [#allocation2]  }
  0x11   : > { %690 = vmatprep.subr.bf16.mxu0 (!%p250_p10), %v881_v1  ;;  %724 = vmatprep.mubr.msk.bf16.mxu1 (!%p250_p10), %vm882_vm0, %v881_v1  ;;  %v796_v10 = vld [vmem:[%s1097_s4 + $0x18] sm:$0xff] (!%p250_p10)   ;;  %v791_v11 = vld [vmem:[%s1096_s3 + $0x30] sm:$0xff] (!%p250_p10)   ;;  %v797_v12 = vld [vmem:[%s1097_s4 + $0x20] sm:$0xff] (!%p250_p10)   ;;  %s286_s19 = scalar_lea.vmem (!%p250_p10), [#allocation2], %s645_s15  ;;  %s805_s11 = sshll.u32 (!%p250_p10), %s883_s8, 4  ;;  %s806_s11 = int_to_ptr.vmem [resolvable:$false] %s805_s11 }
  0x12   : > { %709 = vmatpush3.bf16.msra.mxu1 (!%p250_p10), %v793_v4  ;;  %v792_v13 = vld [vmem:[%s1096_s3 + $0x38] sm:$0xff] (!%p250_p10)   ;;  %v798_v15 = vld [vmem:[%s1097_s4 + $0x28] sm:$0xff] (!%p250_p10)   ;;  %v799_v17 = vld [vmem:[%s1097_s4 + $0x30] sm:$0xff] (!%p250_p10)  }
  0x13   : > { %710 = vmatprep.subr.bf16.mxu1 (!%p250_p10), %v881_v1  ;;  %v800_v18 = vld [vmem:[%s1097_s4 + $0x38] sm:$0xff] (!%p250_p10)   ;;  %v657_v28 = vld [vmem:[%s1098_s5] ss:$0 sm:$0xff] (!%p250_p10) }
  0x14   : > { %691 = vmatpush3.bf16.msra.mxu0 (!%p250_p10), %v786_v2 }
  0x15   : > { %692 = vmatprep.subr.bf16.mxu0 (!%p250_p10), %v881_v1 }
  0x16   : > { %711 = vmatpush3.bf16.msra.mxu1 %v794_v6  ;;  %s1000_s13 = scalar_select %p287_p11, %s871_s24, 1 }
  0x17   : > { %712 = vmatprep.subr.bf16.mxu1 %v881_v1 }
  0x18   : > { %693 = vmatpush3.bf16.msra.mxu0 %v787_v3  ;;  %s646_s18 = sshll.u32 %s1000_s13, 3  ;;  %s299_s12 = scalar_lea.vmem %s1095_s2, %s1000_s13 }
  0x19   : > { %694 = vmatprep.subr.bf16.mxu0 %v881_v1  ;;  %s293_s30 = scalar_lea.vmem %s1093_s0, %s646_s18  ;;  %v656_v21 = vld [vmem:[%s299_s12] ss:$0 sm:$0xff]  ;;  %s667_s18 = sshll.u32 %s871_s24, 7 }
  0x1a   : > { %713 = vmatpush3.bf16.msra.mxu1 %v795_v8  ;;  %v301_v14 = vld [vmem:[%s293_s30] sm:$0xff]  ;;  %s296_s30 = scalar_lea.vmem %s1094_s1, %s1000_s13  ;;  %s551_s13 = sshll.u32 %s286_s19, 4  ;;  %s1048_s13 = int_to_ptr.vmem [resolvable:$true] %s551_s13 }
  0x1b   : > { %714 = vmatprep.subr.bf16.mxu1 %v881_v1  ;;  %v302_v16 = vpack.c.bf16 %v301_v14, %v301_v14  ;;  %v655_v19 = vld [vmem:[%s296_s30] ss:$0 sm:$0xff]  ;;  %s1046_s28 = scalar_lea.hbm %s1099_s6, %s667_s18  ;;  %s537_s30 = scalar_lea.sflag [#allocation3], %s284_s14 }
  0x1c   : > { %695 = vmatpush3.bf16.msra.mxu0 %v788_v5  ;;  %s801_s24 = scalar_lea.vmem %s1048_s13, 128  ;;  %s807_s12 = scalar_lea.vmem %s806_s11, 256 }
  0x1d   : > { %696 = vmatprep.subr.bf16.mxu0 %v881_v1  ;;  %p802_p12 = scmp.ne.s32.totalorder %s1048_s13, %s801_s24  ;;  %p808_p1 = scmp.lt.s32.totalorder %s1048_s13, %s806_s11 }
  0x1e   : > { %715 = vmatpush3.bf16.msra.mxu1 %v796_v10  ;;  %p809_p2 = scmp.lt.s32.totalorder %s807_s12, %s801_s24 }
  0x1f   : > { %716 = vmatprep.subr.bf16.mxu1 %v881_v1  ;;  %p803_p13 = pnand %p802_p12, %p959_p4 }
  0x20   : > { %697 = vmatpush3.bf16.msra.mxu0 %v789_v7  ;;  %p810_p3 = por %p809_p2, %p808_p1 }
  0x21   : > { %698 = vmatprep.subr.bf16.mxu0 %v881_v1  ;;  %p804_p0 = pneg %p803_p13 }
  0x22   : > { %717 = vmatpush3.bf16.msra.mxu1 %v797_v12 }
  0x23   : > { %718 = vmatprep.subr.bf16.mxu1 %v881_v1  ;;  %p811_p5 = pnand %p810_p3, %p804_p0 }
  0x24   : > { %699 = vmatpush3.bf16.msra.mxu0 %v790_v9 }
  0x25   : > { %700 = vmatprep.subr.bf16.mxu0 %v881_v1 }
  0x26   : > { %719 = vmatpush3.bf16.msra.mxu1 %v798_v15 }
  0x27   : > { %720 = vmatprep.subr.bf16.mxu1 %v881_v1 }
  0x28   : > { %701 = vmatpush3.bf16.msra.mxu0 %v791_v11 }
  0x29   : > { %702 = vmatprep.subr.bf16.mxu0 %v881_v1 }
  0x2a   : > { %721 = vmatpush3.bf16.msra.mxu1 %v799_v17 }
  0x2b   : > { %722 = vmatprep.subr.bf16.mxu1 %v881_v1 }
  0x2c   : > { %703 = vmatpush3.bf16.msra.mxu0 %v792_v13 }
  0x2e   : > { %723 = vmatpush3.bf16.msra.mxu1 %v800_v18 }
  0x2f   : > { %705 = vmatmul.mubr.bf16.vlgmr.msra.gmra.mrb[0].mxu0 %v302_v16 }
 0x102   : > { %v401_v20 = vpop.f32.mrb[0].mxu0 }
 0x103   : > { %v414_v22 = vmul.f32 %v655_v19, %v401_v20  ;;  %v706_v23 = vpop.f32.mrb[1].mxu0 }
 0x104   : > { %v404_v24 = vpop.f32.mrb[2].mxu0 }
 0x105   : > { %v422_v25 = vadd.f32 %v656_v21, %v414_v22  ;;  %v707_v26 = vpop.f32.mrb[3].mxu0 }
 0x107   : > { %v423_v27 = vpack.c.bf16 %v422_v25, %v422_v25 }
 0x109   : > { %725 = vmatmul.mubr.bf16.vlgmr.msra.gmra.mrb[0].mxu1 %v423_v27 }
 0x1dc   : > { %v529_v29 = vpop.f32.mrb[0].mxu1 }
 0x1dd   : > { %v530_v30 = vadd.f32 %v657_v28, %v529_v29  ;;  %v726_v31 = vpop.f32.mrb[1].mxu1 }
 0x1de   : > { %v532_v32 = vpop.f32.mrb[2].mxu1 }
 0x1df   : > { %535 = vst [vmem:[%s286_s19] sm:$0xff] %v530_v30  ;;  %v727_v33 = vpop.f32.mrb[3].mxu1 }
 0x1e0   : > { %814 = shalt.err (!%p811_p5)
}
 0x1e1   : > { %s815_s14 = scalar_lea.hbm %s1046_s28, 128  ;;  %s819_s17 = scalar_lea.hbm %s1099_s6, 256 }
 0x1e2   : > { %p816_p6 = scmp.ne.s32.totalorder %s1046_s28, %s815_s14  ;;  %p820_p10 = scmp.lt.u32.totalorder %s1046_s28, %s1099_s6 }
 0x1e3   : > { %p821_p11 = scmp.lt.u32.totalorder %s819_s17, %s815_s14  ;;  %p823_p13 = scmp.lt.u32.totalorder %s815_s14, %s1046_s28 }
 0x1e4   : > { %p817_p7 = pnand %p816_p6, %p959_p4 }
 0x1e5   : > { %p822_p12 = por %p821_p11, %p820_p10 }
 0x1e6   : > { %p818_p9 = pneg %p817_p7 }
 0x1e7   : > { %p824_p0 = por %p823_p13, %p822_p12 }
 0x1e9   : > { %p825_p1 = pnand %p824_p0, %p818_p9 }
 0x1eb   : > { %828 = shalt.err (!%p825_p1)
}
 0x1ec   : > { %728 = dma.vmem_to_hbm [thread:$0]  (%p959_p4), %s1048_s13, 128, %s1046_s28, %s537_s30  }
 0x1ed PF: > { %p734_p2 = scmp.ge.s32.totalorder %s879_s26, 2  ;;  %s563_s20 = sand.u32 1, %s859_s21  }
 0x1ee   : > { %s564_s27 = scalar_lea.sflag [#allocation3], %s563_s20 }
 0x1ef   : > { %p731_p3 = pnand %p734_p2, %p966_p8 }
 0x1f1   : > { %854 = dma.done.wait (!%p731_p3), %s564_s27, 128  }
 0x1f2   : > { %856 = vsyncadd (!%p731_p3), %s564_s27, 4294967168  ;;  %s19_s26 = sadd.s32 1, %s879_s26   ;;  %s1102_s21 = smov %s863_s22 }
 0x1f3   : > { %p16_p5 = scmp.ge.s32.totalorder %s19_s26, 4   ;;  %s1103_s22 = smov %s867_s23 }
 0x1f4   : > { %s1104_s23 = smov %s972_s10  ;;  %s1105_s24 = smov %s875_s25 }
 0x1f5   : > { %s1106_s25 = smov %s1108_s29  ;;  %18 = sbr.rel (!%p16_p5) target bundleno = 4 (0x4), region = 85 }
 0x1fc   :  { %569 = vsyncpa [#allocation3], 1 }
 0x1fd   :  { %571 = vsyncpa [#allocation3 + $0x1], 1 }

</bundles_post_ra>
